<compile_context>
chip_gen: v5e
topology: v5e:2x2
jax: 0.10.0
libtpu: 0.0.40
codegen_flags: <defaults>
</compile_context>

<pallas_src>
import jax
import jax.numpy as jnp
from jax.experimental import pallas as pl
from jax.experimental.pallas import tpu as pltpu

DIS_INPUT_DIM = 11 + 3 + 11  # = 25
H1 = 128
H2 = 64
OUT = 1


def _leaky_relu(x, negative_slope=0.2):
    # For slope in (0,1): max(x, a*x) == LeakyReLU(x); one mul+max instead of
    # cmp+select+mul.
    return jnp.maximum(x, negative_slope * x)


def discriminator_kernel(x_ref, w1_ref, b1_ref, w2_ref, b2_ref, w3_ref, b3_ref, o_ref):
    # x tile arrives feature-major (25, TB) in bf16; weights w1/w2 are bf16 in
    # PyTorch (out, in) layout; biases and w3 column are f32.
    x = x_ref[...]                                               # (25, TB) bf16

    # Layer 1: (128, 25) @ (25, TB) bf16 MXU matmul, f32 accumulation.
    h1 = jnp.dot(w1_ref[...], x, preferred_element_type=jnp.float32)
    h1 = _leaky_relu(h1 + b1_ref[...])                           # (128, TB) f32

    # Layer 2: (64, 128) @ (128, TB) bf16 MXU matmul, f32 accumulation.
    h2 = jnp.dot(w2_ref[...], h1.astype(jnp.bfloat16),
                 preferred_element_type=jnp.float32)
    h2 = _leaky_relu(h2 + b2_ref[...])                           # (64, TB) f32

    # Layer 3 (out_features == 1): VPU multiply + sublane reduce instead of an
    # N=1 MXU matmul; result is already lane-dense (1, TB), all in f32.
    h3 = jnp.sum(h2 * w3_ref[...], axis=0, keepdims=True) + b3_ref[...]   # (1, TB)

    o_ref[...] = h3.astype(o_ref.dtype)


def _round_up(a, m):
    return ((a + m - 1) // m) * m


def discriminator_forward(x, params, *, tb=2048):
    """x: (B, 25) float32. Returns (B, 1) float32.

    tb = batch tile (columns of the feature-major slab per grid step); multiple of
    128. Default 2048 amortizes the ~0.35us per-step overhead; capped so there are
    at least two grid steps when B allows (v7x megacore). VMEM stays far under the
    v5e 16 MiB scoped default at tb=2048 (bf16 x tile ~100 KB, f32 intermediates
    ~1.5 MB), so no vmem_limit_bytes override is needed.
    """
    w1, b1, w2, b2, w3, b3 = params
    B = x.shape[0]

    # Keep tb a multiple of 128, never below 128, and small enough that B splits
    # into >= 2 tiles when possible (so both v7x TensorCores get work).
    tb = max(128, min(tb, _round_up(pl.cdiv(B, 2), 128)))
    num_tiles = pl.cdiv(B, tb)
    b_pad = num_tiles * tb   # output slab width; no wrapper pad of x needed —
                             # Pallas pads the final (partial) x block and the
                             # garbage columns are sliced off below.

    # Single fused XLA pass: transpose to feature-major + cast to bf16.
    x_t = x.T.astype(jnp.bfloat16)          # (25, B) bf16, lane-dense per tile
    w1_b = w1.astype(jnp.bfloat16)          # (128, 25)
    w2_b = w2.astype(jnp.bfloat16)          # (64, 128)
    w3_col = jnp.reshape(w3, (H2, OUT))     # (64, 1) f32 column for the VPU reduce

    x_spec = pl.BlockSpec((DIS_INPUT_DIM, tb), lambda i: (0, i))
    if num_tiles >= 4:
        # Deeper buffering on the only streamed operand hides residual DMA latency
        # behind the short per-tile compute (ample VMEM headroom on all gens).
        x_spec = pl.BlockSpec((DIS_INPUT_DIM, tb), lambda i: (0, i),
                              pipeline_mode=pl.Buffered(3))

    out = pl.pallas_call(
        discriminator_kernel,
        out_shape=jax.ShapeDtypeStruct((1, b_pad), jnp.float32),
        grid_spec=pltpu.PrefetchScalarGridSpec(
            num_scalar_prefetch=0,
            grid=(num_tiles,),
            in_specs=[
                x_spec,                                                # x: streamed per tile
                pl.BlockSpec((H1, DIS_INPUT_DIM), lambda i: (0, 0)),   # w1 (bf16): resident
                pl.BlockSpec((H1, 1), lambda i: (0, 0)),               # b1: resident
                pl.BlockSpec((H2, H1), lambda i: (0, 0)),              # w2 (bf16): resident
                pl.BlockSpec((H2, 1), lambda i: (0, 0)),               # b2: resident
                pl.BlockSpec((H2, OUT), lambda i: (0, 0)),             # w3 column: resident
                pl.BlockSpec((1, 1), lambda i: (0, 0)),                # b3: resident
            ],
            out_specs=pl.BlockSpec((1, tb), lambda i: (0, i)),         # lane-dense output slab
        ),
        compiler_params=pltpu.CompilerParams(
            dimension_semantics=("parallel",),                         # megacore split on v7x
        ),
    )(x_t, w1_b, b1, w2_b, b2, w3_col, b3)

    return out[0, :B, None]                                            # (B, 1)


def init_params(key):
    """PyTorch nn.Linear default init (U(-1/sqrt(fan_in), 1/sqrt(fan_in))).
    Weights in PyTorch (out_features, in_features) layout; biases as (out, 1)."""
    k1, k2, k3, k4, k5, k6 = jax.random.split(key, 6)

    def lin_init(kw, kb, fan_in, fan_out):
        bound = float(fan_in) ** -0.5
        w = jax.random.uniform(kw, (fan_out, fan_in), jnp.float32, -bound, bound)
        b = jax.random.uniform(kb, (fan_out, 1), jnp.float32, -bound, bound)
        return w, b

    w1, b1 = lin_init(k1, k2, DIS_INPUT_DIM, H1)   # (128, 25), (128, 1)
    w2, b2 = lin_init(k3, k4, H1, H2)              # (64, 128), (64, 1)
    w3, b3 = lin_init(k5, k6, H2, OUT)             # (1, 64),   (1, 1)
    return (w1, b1, w2, b2, w3, b3)


def reference_forward(x, params):
    w1, b1, w2, b2, w3, b3 = params
    hi = jax.lax.Precision.HIGHEST
    h1 = _leaky_relu(jnp.dot(x, w1.T, precision=hi) + b1.T)
    h2 = _leaky_relu(jnp.dot(h1, w2.T, precision=hi) + b2.T)
    return jnp.dot(h2, w3.T, precision=hi) + b3.T


if __name__ == "__main__":
    key = jax.random.PRNGKey(0)
    k_params, k_x = jax.random.split(key)

    params = init_params(k_params)
    batch = 8
    x = jax.random.normal(k_x, (batch, DIS_INPUT_DIM), dtype=jnp.float32)

    out = discriminator_forward(x, params)
    out = jax.block_until_ready(out)

    ref = reference_forward(x, params)
    assert out.shape == (batch, OUT), out.shape
    # bf16 MXU operands with f32 accumulation: relaxed (but still tight) tolerance
    # vs. the full-f32 reference.
    assert jnp.allclose(out, ref, atol=3e-2, rtol=3e-2), (out, ref)

    print("KERNEL_OK")
</pallas_src>

<mosaic_0001>
module attributes {stable_mosaic.version = 11 : i64} {
  func.func @discriminator_kernel(%arg0: i32, %arg1: memref<25x128xbf16, #tpu.memory_space<vmem>>, %arg2: memref<128x25xbf16, #tpu.memory_space<vmem>>, %arg3: memref<128x1xf32, #tpu.memory_space<vmem>>, %arg4: memref<64x128xbf16, #tpu.memory_space<vmem>>, %arg5: memref<64x1xf32, #tpu.memory_space<vmem>>, %arg6: memref<64x1xf32, #tpu.memory_space<vmem>>, %arg7: memref<1x1xf32, #tpu.memory_space<vmem>>, %arg8: memref<1x128xf32, #tpu.memory_space<vmem>>) attributes {dimension_semantics = [#tpu.dimension_semantics<parallel>], iteration_bounds = array<i64: 1>, scalar_prefetch = 0 : i64, scratch_operands = 0 : i64, tpu.core_type = #tpu.core_type<tc>, window_params = [{transform_indices = @transform_0, window_bounds = array<i64: 25, 128>}, {pipeline_mode = #tpu.pipeline_mode<synchronous>, transform_indices = @transform_1, window_bounds = array<i64: 128, 25>}, {pipeline_mode = #tpu.pipeline_mode<synchronous>, transform_indices = @transform_2, window_bounds = array<i64: 128, 1>}, {pipeline_mode = #tpu.pipeline_mode<synchronous>, transform_indices = @transform_3, window_bounds = array<i64: 64, 128>}, {pipeline_mode = #tpu.pipeline_mode<synchronous>, transform_indices = @transform_4, window_bounds = array<i64: 64, 1>}, {pipeline_mode = #tpu.pipeline_mode<synchronous>, transform_indices = @transform_5, window_bounds = array<i64: 64, 1>}, {pipeline_mode = #tpu.pipeline_mode<synchronous>, transform_indices = @transform_6, window_bounds = array<i64: 1, 1>}, {transform_indices = @transform_7, window_bounds = array<i64: 1, 128>}]} {
    %c0 = arith.constant 0 : index
    %c0_0 = arith.constant 0 : index
    %0 = vector.load %arg1[%c0, %c0_0] : memref<25x128xbf16, #tpu.memory_space<vmem>>, vector<25x128xbf16>
    %c0_1 = arith.constant 0 : index
    %c0_2 = arith.constant 0 : index
    %1 = vector.load %arg2[%c0_1, %c0_2] : memref<128x25xbf16, #tpu.memory_space<vmem>>, vector<128x25xbf16>
    %cst = arith.constant dense<0.000000e+00> : vector<128x128xf32>
    %2 = tpu.matmul %1, %0, %cst {dimension_numbers = #tpu.dot_dimension_numbers<[1], [0], [0], [1], [0, 0, 1, 1], [], []>} : vector<128x25xbf16>, vector<25x128xbf16>, vector<128x128xf32> -> vector<128x128xf32>
    %c0_3 = arith.constant 0 : index
    %c0_4 = arith.constant 0 : index
    %3 = vector.load %arg3[%c0_3, %c0_4] : memref<128x1xf32, #tpu.memory_space<vmem>>, vector<128x1xf32>
    %4 = vector.broadcast %3 : vector<128x1xf32> to vector<128x128xf32>
    %5 = arith.addf %2, %4 : vector<128x128xf32>
    %cst_5 = arith.constant 2.000000e-01 : f32
    %6 = vector.broadcast %cst_5 : f32 to vector<128x128xf32>
    %7 = arith.mulf %6, %5 : vector<128x128xf32>
    %8 = arith.maximumf %5, %7 : vector<128x128xf32>
    %c0_6 = arith.constant 0 : index
    %c0_7 = arith.constant 0 : index
    %9 = vector.load %arg4[%c0_6, %c0_7] : memref<64x128xbf16, #tpu.memory_space<vmem>>, vector<64x128xbf16>
    %10 = arith.truncf %8 : vector<128x128xf32> to vector<128x128xbf16>
    %cst_8 = arith.constant dense<0.000000e+00> : vector<64x128xf32>
    %11 = tpu.matmul %9, %10, %cst_8 {dimension_numbers = #tpu.dot_dimension_numbers<[1], [0], [0], [1], [0, 0, 1, 1], [], []>} : vector<64x128xbf16>, vector<128x128xbf16>, vector<64x128xf32> -> vector<64x128xf32>
    %c0_9 = arith.constant 0 : index
    %c0_10 = arith.constant 0 : index
    %12 = vector.load %arg5[%c0_9, %c0_10] : memref<64x1xf32, #tpu.memory_space<vmem>>, vector<64x1xf32>
    %13 = vector.broadcast %12 : vector<64x1xf32> to vector<64x128xf32>
    %14 = arith.addf %11, %13 : vector<64x128xf32>
    %cst_11 = arith.constant 2.000000e-01 : f32
    %15 = vector.broadcast %cst_11 : f32 to vector<64x128xf32>
    %16 = arith.mulf %15, %14 : vector<64x128xf32>
    %17 = arith.maximumf %14, %16 : vector<64x128xf32>
    %c0_12 = arith.constant 0 : index
    %c0_13 = arith.constant 0 : index
    %18 = vector.load %arg6[%c0_12, %c0_13] : memref<64x1xf32, #tpu.memory_space<vmem>>, vector<64x1xf32>
    %19 = vector.broadcast %18 : vector<64x1xf32> to vector<64x128xf32>
    %20 = arith.mulf %17, %19 : vector<64x128xf32>
    %cst_14 = arith.constant dense<0.000000e+00> : vector<128xf32>
    %21 = vector.multi_reduction <add>, %20, %cst_14 [0] : vector<64x128xf32> to vector<128xf32>
    %22 = vector.shape_cast %21 : vector<128xf32> to vector<1x128xf32>
    %c0_15 = arith.constant 0 : index
    %c0_16 = arith.constant 0 : index
    %23 = vector.load %arg7[%c0_15, %c0_16] : memref<1x1xf32, #tpu.memory_space<vmem>>, vector<1x1xf32>
    %24 = vector.broadcast %23 : vector<1x1xf32> to vector<1x128xf32>
    %25 = arith.addf %22, %24 : vector<1x128xf32>
    %c0_17 = arith.constant 0 : index
    %c0_18 = arith.constant 0 : index
    %26 = vector.load %arg8[%c0_17, %c0_18] : memref<1x128xf32, #tpu.memory_space<vmem>>, vector<1x128xf32>
    tpu.vector_store %arg8[%c0_17, %c0_18], %25 {strides = array<i32>} : memref<1x128xf32, #tpu.memory_space<vmem>>, vector<1x128xf32>,
    return
  }
  func.func @transform_0(%arg0: i32) -> (i32, i32) {
    %c0_i32 = arith.constant 0 : i32
    %c0_i32_0 = arith.constant 0 : i32
    return %c0_i32, %arg0 : i32, i32
  }
  func.func @transform_1(%arg0: i32) -> (i32, i32) {
    %c0_i32 = arith.constant 0 : i32
    %c0_i32_0 = arith.constant 0 : i32
    %c0_i32_1 = arith.constant 0 : i32
    return %c0_i32, %c0_i32_0 : i32, i32
  }
  func.func @transform_2(%arg0: i32) -> (i32, i32) {
    %c0_i32 = arith.constant 0 : i32
    %c0_i32_0 = arith.constant 0 : i32
    %c0_i32_1 = arith.constant 0 : i32
    return %c0_i32, %c0_i32_0 : i32, i32
  }
  func.func @transform_3(%arg0: i32) -> (i32, i32) {
    %c0_i32 = arith.constant 0 : i32
    %c0_i32_0 = arith.constant 0 : i32
    %c0_i32_1 = arith.constant 0 : i32
    return %c0_i32, %c0_i32_0 : i32, i32
  }
  func.func @transform_4(%arg0: i32) -> (i32, i32) {
    %c0_i32 = arith.constant 0 : i32
    %c0_i32_0 = arith.constant 0 : i32
    %c0_i32_1 = arith.constant 0 : i32
    return %c0_i32, %c0_i32_0 : i32, i32
  }
  func.func @transform_5(%arg0: i32) -> (i32, i32) {
    %c0_i32 = arith.constant 0 : i32
    %c0_i32_0 = arith.constant 0 : i32
    %c0_i32_1 = arith.constant 0 : i32
    return %c0_i32, %c0_i32_0 : i32, i32
  }
  func.func @transform_6(%arg0: i32) -> (i32, i32) {
    %c0_i32 = arith.constant 0 : i32
    %c0_i32_0 = arith.constant 0 : i32
    %c0_i32_1 = arith.constant 0 : i32
    return %c0_i32, %c0_i32_0 : i32, i32
  }
  func.func @transform_7(%arg0: i32) -> (i32, i32) {
    %c0_i32 = arith.constant 0 : i32
    %c0_i32_0 = arith.constant 0 : i32
    return %c0_i32, %arg0 : i32, i32
  }
}

</mosaic_0001>

<bundles_post_ra>
// kernel: tpu_custom_call.1
= control target key start
LH: loop header
LB: loop body
LE: loop exit
PB: predicated region body
PF: predicated region fallthrough
CT: control target
= control target key end

     0   :  { %s867_s0 = inlined_call_operand.vmem [shape: bf16[25,8], index: 0, kind: input, shape index: {}]   ;;  %s868_s1 = inlined_call_operand.vmem [shape: bf16[128,25], index: 1, kind: input, shape index: {}]   ;;  %s869_s2 = inlined_call_operand.vmem [shape: f32[128,1], index: 2, kind: input, shape index: {}]   ;;  %s870_s3 = inlined_call_operand.vmem [shape: bf16[64,128], index: 3, kind: input, shape index: {}]   ;;  %s871_s4 = inlined_call_operand.vmem [shape: f32[64,1], index: 4, kind: input, shape index: {}]   ;;  %s872_s5 = inlined_call_operand.vmem [shape: f32[64,1], index: 5, kind: input, shape index: {}]   ;;  %s873_s6 = inlined_call_operand.<no memory space> [shape: f32[1,1], index: 6, kind: input, shape index: {}]   ;;  %s874_s7 = inlined_call_operand.hbm [shape: f32[1,128], index: 7, kind: output, shape index: {}]  }
   0x1   :  { %v12_v0 = vstv %s873_s6 }
   0x2   :  { %13 = vst [vmem:[#allocation2] sm:$0x1] %v12_v0 }
   0x3   :  { %v64_v1 = vld [vmem:[%s869_s2 + $0x70] sm:$0xff]  ;;  %v62_v2 = vld [vmem:[%s869_s2 + $0x60] sm:$0xff]  ;;  %v575_v3 = vld [vmem:[%s867_s0 + $0x8] sm:$0xf]  ;;  %vm222_vm0 = vcmask 1043456   ;;  %v657_v4 = vmov 0  }
   0x4   :  { %629 = vset.pattern.permute.xlu1 %v657_v4  ;;  %628 = vset.pattern.permute.xlu0 %v657_v4  ;;  %v602_v5 = vld [vmem:[%s867_s0 + $0x8] sm:$0x10]  ;;  %vm223_vm1 = vcmask 1044480   ;;  %v658_v7 = vmov 65535   ;;  %v60_v10 = vld [vmem:[%s869_s2 + $0x50] sm:$0xff]  ;;  %v601_v12 = vld [vmem:[%s867_s0] sm:$0xff] }
   0x5   :  { %138 = vperm.xlu0 %628, %v64_v1   ;;  %128 = vperm.xlu1 %629, %v62_v2   ;;  %v576_v6 = vor.u32 %v602_v5, %v575_v3  ;;  %v224_v8 = vsel %vm222_vm0, 4294967295, %v658_v7 }
   0x6   :  { %v225_v9 = vsel %vm223_vm1, %v224_v8, 0  ;;  %630 = vset.pattern.permute.xlu2 %v657_v4 }
   0x7   :  { %v227_v11 = vand.u32 %v576_v6, %v225_v9  ;;  %118 = vperm.xlu2 %630, %v60_v10  }
   0x9   :  { %235 = vmatpush.bf16.msra.mxu0 %v227_v11  ;;  %615 = vmatpush.bf16.msra.mxu2 %v227_v11 }
   0xa   :  { %14 = vsyncpa [#allocation4], 0  ;;  %v65_v13 = vld [vmem:[%s869_s2 + $0x78] sm:$0xff]  ;;  %v63_v14 = vld [vmem:[%s869_s2 + $0x68] sm:$0xff]  ;;  %vm197_vm2 = vcmask 203776   ;;  %s528_s19 = sshll.u32 %s874_s7, 4  ;;  %s529_s19 = int_to_ptr.hbm [resolvable:$true] %s528_s19 }
   0xb   :  { %v603_v15 = vld [vmem:[%s868_s1] sm:$0xff]  ;;  %v61_v17 = vld [vmem:[%s869_s2 + $0x58] sm:$0xff]  ;;  %v59_v18 = vld [vmem:[%s869_s2 + $0x48] sm:$0xff] }
   0xc   :  { %v607_v16 = vld [vmem:[%s868_s1 + $0x20] sm:$0xff]  ;;  %v56_v20 = vld [vmem:[%s869_s2 + $0x30] sm:$0xff]  ;;  %v57_v21 = vld [vmem:[%s869_s2 + $0x38] sm:$0xff] }
   0xd   :  { %236 = vmatpush.bf16.msra.mxu0 %v601_v12  ;;  %616 = vmatpush.bf16.msra.mxu2 %v601_v12  ;;  %v58_v19 = vld [vmem:[%s869_s2 + $0x40] sm:$0xff]  ;;  %v604_v23 = vld [vmem:[%s868_s1 + $0x8] sm:$0xff]  ;;  %v53_v26 = vld [vmem:[%s869_s2 + $0x18] sm:$0xff] }
   0xe   :  { %143 = vperm.xlu0 %628, %v65_v13   ;;  %133 = vperm.xlu1 %629, %v63_v14   ;;  %v54_v22 = vld [vmem:[%s869_s2 + $0x20] sm:$0xff]  ;;  %v608_v24 = vld [vmem:[%s868_s1 + $0x28] sm:$0xff]  ;;  %v52_v27 = vld [vmem:[%s869_s2 + $0x10] sm:$0xff] }
   0xf   :  { %123 = vperm.xlu2 %630, %v61_v17   ;;  %v55_v25 = vld [vmem:[%s869_s2 + $0x28] sm:$0xff]  ;;  %v50_v28 = vld [vmem:[%s869_s2] sm:$0xff]  ;;  %v605_v31 = vld [vmem:[%s868_s1 + $0x10] sm:$0xff] }
  0x10   :  { %577 = vmatmul.msk.bf16.vlgmr.msra.gmra.mxu0 %vm197_vm2, %v603_v15  ;;  %581 = vmatmul.msk.bf16.vlgmr.msra.gmra.mxu2 %vm197_vm2, %v607_v16  ;;  %v326_v29 = vld [vmem:[%s871_s4] sm:$0xff]  ;;  %v51_v30 = vld [vmem:[%s869_s2 + $0x8] sm:$0xff]  ;;  %v609_v32 = vld [vmem:[%s868_s1 + $0x30] sm:$0xff] }
  0x11   :  { %v327_v33 = vld [vmem:[%s871_s4 + $0x8] sm:$0xff]  ;;  %v329_v34 = vld [vmem:[%s871_s4 + $0x18] sm:$0xff]  ;;  %v328_v35 = vld [vmem:[%s871_s4 + $0x10] sm:$0xff] }
  0x12   :  { %v330_v36 = vld [vmem:[%s871_s4 + $0x20] sm:$0xff]  ;;  %v331_v38 = vld [vmem:[%s871_s4 + $0x28] sm:$0xff]  ;;  %v606_v39 = vld [vmem:[%s868_s1 + $0x18] sm:$0xff] }
  0x13   :  { %v443_v37 = vld [vmem:[%s872_s5] sm:$0xff]  ;;  %v610_v40 = vld [vmem:[%s868_s1 + $0x38] sm:$0xff]  ;;  %v444_v41 = vld [vmem:[%s872_s5 + $0x8] sm:$0xff] }
  0x14   :  { %v332_v42 = vld [vmem:[%s871_s4 + $0x30] sm:$0xff]  ;;  %v446_v44 = vld [vmem:[%s872_s5 + $0x18] sm:$0xff]  ;;  %v447_v45 = vld [vmem:[%s872_s5 + $0x20] sm:$0xff] }
  0x15   :  { %v445_v43 = vld [vmem:[%s872_s5 + $0x10] sm:$0xff]  ;;  %v333_v46 = vld [vmem:[%s871_s4 + $0x38] sm:$0xff]  ;;  %v448_v47 = vld [vmem:[%s872_s5 + $0x28] sm:$0xff] }
  0x16   :  { %113 = vperm.xlu1 %629, %v59_v18   ;;  %108 = vperm.xlu0 %628, %v58_v19   ;;  %v450_v48 = vld [vmem:[%s872_s5 + $0x38] sm:$0xff]  ;;  %v449_v49 = vld [vmem:[%s872_s5 + $0x30] sm:$0xff]  ;;  %v512_v50 = vld [vmem:[#allocation2] sm:$0x1] }
  0x17   :  { %98 = vperm.xlu2 %630, %v56_v20  }
  0x1e   :  { %103 = vperm.xlu0 %628, %v57_v21   ;;  %88 = vperm.xlu1 %629, %v54_v22  }
  0x1f   :  { %93 = vperm.xlu2 %630, %v55_v25  }
  0x20   :  { %578 = vmatmul.msk.bf16.gmra.mxu0 %vm197_vm2, %v604_v23  ;;  %582 = vmatmul.msk.bf16.gmra.mxu2 %vm197_vm2, %v608_v24 }
  0x26   :  { %83 = vperm.xlu1 %629, %v53_v26   ;;  %78 = vperm.xlu0 %628, %v52_v27  }
  0x27   :  { %68 = vperm.xlu2 %630, %v50_v28  }
  0x2e   :  { %336 = vperm.xlu1 %629, %v326_v29   ;;  %73 = vperm.xlu0 %628, %v51_v30  }
  0x2f   :  { %341 = vperm.xlu2 %630, %v327_v33  }
  0x30   :  { %579 = vmatmul.msk.bf16.gmra.mxu0 %vm197_vm2, %v605_v31  ;;  %583 = vmatmul.msk.bf16.gmra.mxu2 %vm197_vm2, %v609_v32 }
  0x36   :  { %351 = vperm.xlu1 %629, %v329_v34   ;;  %346 = vperm.xlu0 %628, %v328_v35  }
  0x37   :  { %356 = vperm.xlu2 %630, %v330_v36  }
  0x3e   :  { %453 = vperm.xlu1 %629, %v443_v37   ;;  %361 = vperm.xlu0 %628, %v331_v38  }
  0x3f   :  { %458 = vperm.xlu2 %630, %v444_v41  }
  0x40   :  { %580 = vmatmul.msk.bf16.gmra.mxu0 %vm197_vm2, %v606_v39  ;;  %584 = vmatmul.msk.bf16.gmra.mxu2 %vm197_vm2, %v610_v40 }
  0x46   :  { %366 = vperm.xlu1 %629, %v332_v42   ;;  %463 = vperm.xlu0 %628, %v445_v43  }
  0x47   :  { %468 = vperm.xlu2 %630, %v446_v44  }
  0x4e   :  { %473 = vperm.xlu1 %629, %v447_v45   ;;  %371 = vperm.xlu0 %628, %v333_v46  }
  0x4f   :  { %478 = vperm.xlu2 %630, %v448_v47  }
  0x56   :  { %488 = vperm.xlu1 %629, %v450_v48   ;;  %483 = vperm.xlu0 %628, %v449_v49  }
  0x57   :  { %515 = vperm.xlu2 %630, %v512_v50  }
  0x61   :  { %v119_v0 = vpop.permute.xlu2 %118 }
  0x69   :  { %v124_v5 = vpop.permute.xlu2 %123 }
  0x71   :  { %v99_v13 = vpop.permute.xlu2 %98 }
  0x77   :  { %v139_v59 = vpop.permute.xlu0 %138  ;;  %v129_v61 = vpop.permute.xlu1 %128 }
  0x79   :  { %v94_v35 = vpop.permute.xlu2 %93 }
  0x80   :  { %v144_v63 = vpop.permute.xlu0 %143  ;;  %v134_v2 = vpop.permute.xlu1 %133 }
  0x88   :  { %v109_v4 = vpop.permute.xlu0 %108  ;;  %v114_v7 = vpop.permute.xlu1 %113 }
  0x8d   :  { %v840_v51 = vpop.f32.mrf.mxu0 }
  0x90   :  { %v104_v10 = vpop.permute.xlu0 %103  ;;  %v89_v25 = vpop.permute.xlu1 %88 }
  0x93   :  { %v258_v52 = vpop.f32.mrf.mxu2 }
  0x94   :  { %v259_v29 = vadd.f32 %v258_v52, %v109_v4 }
  0x95   :  { %v842_v53 = vpop.f32.mrf.mxu0 }
  0x96   :  { %v286_v40 = vmul.f32 0.2, %v259_v29 }
  0x98   :  { %v79_v31 = vpop.permute.xlu0 %78  ;;  %v302_v48 = vmax.f32 %v259_v29, %v286_v40  ;;  %v84_v49 = vpop.permute.xlu1 %83 }
  0x9b   :  { %v260_v54 = vpop.f32.mrf.mxu2 }
  0x9c   :  { %v261_v24 = vadd.f32 %v260_v54, %v114_v7 }
  0x9d   :  { %v844_v55 = vpop.f32.mrf.mxu0 }
  0x9e   :  { %v287_v34 = vmul.f32 0.2, %v261_v24  ;;  %v244_v50 = vadd.f32 %v844_v55, %v79_v31 }
  0xa0   :  { %v303_v42 = vmax.f32 %v261_v24, %v287_v34 }
  0xa2   :  { %v322_v54 = vpack.c.bf16 %v303_v42, %v302_v48 }
  0xa3   :  { %v263_v56 = vpop.f32.mrf.mxu2 }
  0xa4   :  { %v264_v20 = vadd.f32 %v263_v56, %v119_v0  ;;  %v74_v56 = vpop.permute.xlu0 %73  ;;  %v280_v0 = vmul.f32 0.2, %v244_v50 }
  0xa5   :  { %v846_v57 = vpop.f32.mrf.mxu0 }
  0xa6   :  { %v288_v32 = vmul.f32 0.2, %v264_v20  ;;  %v246_v52 = vadd.f32 %v846_v57, %v84_v49 }
  0xa8   :  { %v304_v41 = vmax.f32 %v264_v20, %v288_v32 }
  0xab   :  { %v265_v58 = vpop.f32.mrf.mxu2 }
  0xac   :  { %v266_v17 = vadd.f32 %v265_v58, %v124_v5  ;;  %v296_v5 = vmax.f32 %v244_v50, %v280_v0 }
  0xad   :  { %v248_v62 = vpop.f32.mrf.mxu0 }
  0xae   :  { %v289_v26 = vmul.f32 0.2, %v266_v17  ;;  %v249_v43 = vadd.f32 %v248_v62, %v89_v25 }
  0xb0   :  { %v305_v36 = vmax.f32 %v266_v17, %v289_v26  ;;  %v282_v58 = vmul.f32 0.2, %v249_v43 }
  0xb2   :  { %v323_v47 = vpack.c.bf16 %v305_v36, %v304_v41 }
  0xb3   :  { %v268_v60 = vpop.f32.mrf.mxu2 }
  0xb4   :  { %v269_v14 = vadd.f32 %v268_v60, %v129_v61 }
  0xb5   :  { %v250_v3 = vpop.f32.mrf.mxu0 }
  0xb6   :  { %v290_v21 = vmul.f32 0.2, %v269_v14  ;;  %v251_v44 = vadd.f32 %v250_v3, %v94_v35  ;;  %v298_v3 = vmax.f32 %v249_v43, %v282_v58 }
  0xb8   :  { %v306_v33 = vmax.f32 %v269_v14, %v290_v21  ;;  %v614_v14 = vld [vmem:[%s870_s3 + $0x18] sm:$0xff] }
  0xbb   :  { %v270_v1 = vpop.f32.mrf.mxu2 }
  0xbc   :  { %v271_v11 = vadd.f32 %v270_v1, %v134_v2  ;;  %v241_v1 = vadd.f32 %v842_v53, %v74_v56  ;;  %v281_v2 = vmul.f32 0.2, %v246_v52  ;;  %v611_v53 = vld [vmem:[%s870_s3] sm:$0xff] }
  0xbd   :  { %v253_v9 = vpop.f32.mrf.mxu0 }
  0xbe   :  { %v291_v18 = vmul.f32 0.2, %v271_v11  ;;  %v254_v37 = vadd.f32 %v253_v9, %v99_v13  ;;  %v297_v7 = vmax.f32 %v246_v52, %v281_v2  ;;  %v613_v13 = vld [vmem:[%s870_s3 + $0x10] sm:$0xff] }
  0xc0   :  { %v307_v27 = vmax.f32 %v271_v11, %v291_v18  ;;  %v284_v45 = vmul.f32 0.2, %v254_v37  ;;  %v319_v11 = vpack.c.bf16 %v297_v7, %v296_v5  ;;  %v347_v18 = vpop.permute.xlu0 %346 }
  0xc2   :  { %v324_v39 = vpack.c.bf16 %v307_v27, %v306_v33  ;;  %v300_v60 = vmax.f32 %v254_v37, %v284_v45 }
  0xc3   :  { %v273_v6 = vpop.f32.mrf.mxu2 }
  0xc4   :  { %v274_v8 = vadd.f32 %v273_v6, %v139_v59  ;;  %v283_v59 = vmul.f32 0.2, %v251_v44  ;;  %v279_v6 = vmul.f32 0.2, %v241_v1 }
  0xc5   :  { %v255_v30 = vpop.f32.mrf.mxu0 }
  0xc6   :  { %v292_v15 = vmul.f32 0.2, %v274_v8  ;;  %v256_v38 = vadd.f32 %v255_v30, %v104_v10  ;;  %v299_v4 = vmax.f32 %v251_v44, %v283_v59  ;;  %v295_v10 = vmax.f32 %v241_v1, %v279_v6 }
  0xc8   :  { %v308_v22 = vmax.f32 %v274_v8, %v292_v15  ;;  %v285_v46 = vmul.f32 0.2, %v256_v38  ;;  %v320_v8 = vpack.c.bf16 %v299_v4, %v298_v3  ;;  %v337_v15 = vpop.permute.xlu1 %336 }
  0xca   :  { %v301_v61 = vmax.f32 %v256_v38, %v285_v46 }
  0xcb   :  { %v275_v12 = vpop.f32.mrf.mxu2 }
  0xcc   :  { %v276_v16 = vadd.f32 %v275_v12, %v144_v63  ;;  %v69_v63 = vpop.permute.xlu2 %68  ;;  %v321_v55 = vpack.c.bf16 %v301_v61, %v300_v60  ;;  %v612_v12 = vld [vmem:[%s870_s3 + $0x8] sm:$0xff]  ;;  %s659_s3 = smov [#allocation3]  }
  0xcd   :  { %v239_v62 = vadd.f32 %v840_v51, %v69_v63  ;;  %s526_s16 = sshll.u32 %s659_s3, 4  ;;  %s527_s16 = int_to_ptr.vmem [resolvable:$true] %s526_s16 }
  0xce   :  { %v293_v19 = vmul.f32 0.2, %v276_v16 }
  0xcf   :  { %v278_v57 = vmul.f32 0.2, %v239_v62 }
  0xd0   :  { %v309_v23 = vmax.f32 %v276_v16, %v293_v19  ;;  %v352_v19 = vpop.permute.xlu1 %351 }
  0xd1   :  { %v294_v9 = vmax.f32 %v239_v62, %v278_v57 }
  0xd2   :  { %v325_v28 = vpack.c.bf16 %v309_v23, %v308_v22  ;;  %v362_v23 = vpop.permute.xlu0 %361 }
  0xd3   :  { %v318_v51 = vpack.c.bf16 %v295_v10, %v294_v9 }
  0xd4   :  { %398 = vmatpush.bf16.msra.mxu1 %v325_v28  ;;  %617 = vmatpush.bf16.msra.mxu3 %v325_v28  ;;  %v342_v16 = vpop.permute.xlu2 %341 }
  0xd8   :  { %399 = vmatpush.bf16.msra.mxu1 %v324_v39  ;;  %618 = vmatpush.bf16.msra.mxu3 %v324_v39  ;;  %v454_v24 = vpop.permute.xlu1 %453 }
  0xda   :  { %v464_v30 = vpop.permute.xlu0 %463 }
  0xdc   :  { %400 = vmatpush.bf16.msra.mxu1 %v323_v47  ;;  %619 = vmatpush.bf16.msra.mxu3 %v323_v47  ;;  %v357_v22 = vpop.permute.xlu2 %356 }
  0xe0   :  { %401 = vmatpush.bf16.msra.mxu1 %v322_v54  ;;  %620 = vmatpush.bf16.msra.mxu3 %v322_v54  ;;  %v367_v36 = vpop.permute.xlu1 %366 }
  0xe2   :  { %v372_v46 = vpop.permute.xlu0 %371 }
  0xe4   :  { %402 = vmatpush.bf16.msra.mxu1 %v321_v55  ;;  %621 = vmatpush.bf16.msra.mxu3 %v321_v55  ;;  %v459_v28 = vpop.permute.xlu2 %458 }
  0xe8   :  { %403 = vmatpush.bf16.msra.mxu1 %v320_v8  ;;  %622 = vmatpush.bf16.msra.mxu3 %v320_v8  ;;  %v474_v60 = vpop.permute.xlu1 %473 }
  0xea   :  { %v484_v6 = vpop.permute.xlu0 %483 }
  0xec   :  { %404 = vmatpush.bf16.msra.mxu1 %v319_v11  ;;  %623 = vmatpush.bf16.msra.mxu3 %v319_v11  ;;  %v469_v43 = vpop.permute.xlu2 %468 }
  0xf0   :  { %405 = vmatpush.bf16.msra.mxu1 %v318_v51  ;;  %624 = vmatpush.bf16.msra.mxu3 %v318_v51  ;;  %v489_v51 = vpop.permute.xlu1 %488 }
  0xf3   :  { %406 = vmatmul.bf16.vlgmr.msra.gmra.mxu1 %v611_v53  ;;  %411 = vmatmul.bf16.vlgmr.msra.gmra.mxu3 %v612_v12 }
  0xf4   :  { %v479_v3 = vpop.permute.xlu2 %478 }
 0x103   :  { %416 = vmatmul.bf16.gmra.mxu3 %v613_v13 }
 0x113   :  { %421 = vmatmul.bf16.gmra.mxu3 %v614_v14 }
 0x170   :  { %v407_v20 = vpop.f32.mrf.mxu1 }
 0x171   :  { %v408_v29 = vadd.f32 %v407_v20, %v337_v15 }
 0x173   :  { %v427_v32 = vmul.f32 0.2, %v408_v29 }
 0x175   :  { %v435_v39 = vmax.f32 %v408_v29, %v427_v32 }
 0x176   :  { %v412_v17 = vpop.f32.mrf.mxu3 }
 0x177   :  { %v413_v34 = vadd.f32 %v412_v17, %v347_v18  ;;  %v491_v47 = vmul.f32 %v454_v24, %v435_v39  ;;  %v516_v18 = vpop.permute.xlu2 %515 }
 0x178   :  { %v409_v25 = vpop.f32.mrf.mxu1  ;;  %v518_v20 = vperm.slane %v516_v18, 0 }
 0x179   :  { %v410_v27 = vadd.f32 %v409_v25, %v342_v16  ;;  %v429_v40 = vmul.f32 0.2, %v413_v34 }
 0x17b   :  { %v428_v31 = vmul.f32 0.2, %v410_v27  ;;  %v437_v49 = vmax.f32 %v413_v34, %v429_v40 }
 0x17d   :  { %v436_v37 = vmax.f32 %v410_v27, %v428_v31  ;;  %v493_v61 = vmul.f32 %v464_v30, %v437_v49 }
 0x17e   :  { %v414_v21 = vpop.f32.mrf.mxu3 }
 0x17f   :  { %v415_v35 = vadd.f32 %v414_v21, %v352_v19  ;;  %v492_v44 = vmul.f32 %v459_v28, %v436_v37 }
 0x181   :  { %v430_v41 = vmul.f32 0.2, %v415_v35  ;;  %v499_v56 = vadd.f32 %v492_v44, %v491_v47 }
 0x183   :  { %v438_v50 = vmax.f32 %v415_v35, %v430_v41  ;;  %v500_v0 = vadd.f32 %v499_v56, %v493_v61 }
 0x185   :  { %v494_v63 = vmul.f32 %v469_v43, %v438_v50 }
 0x186   :  { %v417_v26 = vpop.f32.mrf.mxu3 }
 0x187   :  { %v418_v38 = vadd.f32 %v417_v26, %v357_v22  ;;  %v501_v55 = vadd.f32 %v500_v0, %v494_v63 }
 0x189   :  { %v431_v45 = vmul.f32 0.2, %v418_v38 }
 0x18b   :  { %v439_v58 = vmax.f32 %v418_v38, %v431_v45 }
 0x18d   :  { %v495_v1 = vmul.f32 %v474_v60, %v439_v58 }
 0x18e   :  { %v419_v33 = vpop.f32.mrf.mxu3 }
 0x18f   :  { %v420_v42 = vadd.f32 %v419_v33, %v362_v23  ;;  %v502_v7 = vadd.f32 %v501_v55, %v495_v1 }
 0x191   :  { %v432_v52 = vmul.f32 0.2, %v420_v42 }
 0x193   :  { %v440_v62 = vmax.f32 %v420_v42, %v432_v52 }
 0x195   :  { %v496_v57 = vmul.f32 %v479_v3, %v440_v62 }
 0x196   :  { %v422_v48 = vpop.f32.mrf.mxu3 }
 0x197   :  { %v423_v54 = vadd.f32 %v422_v48, %v367_v36  ;;  %v503_v10 = vadd.f32 %v502_v7, %v496_v57 }
 0x199   :  { %v433_v59 = vmul.f32 0.2, %v423_v54 }
 0x19b   :  { %v441_v2 = vmax.f32 %v423_v54, %v433_v59 }
 0x19d   :  { %v497_v8 = vmul.f32 %v484_v6, %v441_v2 }
 0x19e   :  { %v424_v4 = vpop.f32.mrf.mxu3 }
 0x19f   :  { %v425_v5 = vadd.f32 %v424_v4, %v372_v46  ;;  %v504_v53 = vadd.f32 %v503_v10, %v497_v8 }
 0x1a1   :  { %v434_v9 = vmul.f32 0.2, %v425_v5 }
 0x1a3   :  { %v442_v11 = vmax.f32 %v425_v5, %v434_v9 }
 0x1a5   :  { %v498_v12 = vmul.f32 %v489_v51, %v442_v11 }
 0x1a7   :  { %v505_v13 = vadd.f32 %v504_v53, %v498_v12 }
 0x1a9   :  { %v506_v14 = vrot.slane %v505_v13, 4 }
 0x1ab   :  { %v507_v15 = vadd.f32 %v506_v14, %v505_v13 }
 0x1ad   :  { %v508_v16 = vrot.slane %v507_v15, 2 }
 0x1af   :  { %v509_v17 = vadd.f32 %v508_v16, %v507_v15 }
 0x1b1   :  { %v510_v19 = vrot.slane %v509_v17, 1 }
 0x1b3   :  { %v511_v21 = vadd.f32 %v510_v19, %v509_v17 }
 0x1b5   :  { %v519_v22 = vadd.f32 %v518_v20, %v511_v21 }
 0x1b7   :  { %520 = vst [vmem:[#allocation3] sm:$0x1] %v519_v22 }
 0x1b8   :  { %531 = dma.vmem_to_hbm [thread:$0]  %s527_s16, 16, %s529_s19, [#allocation4]  }
 0x1b9   :  { %655 = dma.done.wait [#allocation4], 16  }
 0x1ba   :  { %656 = vsyncadd [#allocation4], 4294967280 }
 0x1bb   :  { %536 = vsyncpa [#allocation4], 1 }

</bundles_post_ra>
